<compile_context>
chip_gen: v5e
topology: v5e:2x2
jax: 0.10.0
libtpu: 0.0.40
codegen_flags: <defaults>
</compile_context>

<pallas_src>
import jax
import jax.numpy as jnp
import numpy as np
from jax.experimental import pallas as pl
from jax.experimental.pallas import tpu as pltpu

_INV_SQRT2 = 0.7071067811865476
_LN_EPS = 1e-5


def _cnn_block_kernel(x_ref, w_ref, g_ref, bt_ref, o_ref):
    # x_ref  : (1, KKCp, H*W)  im2col slab for one sample (ones row appended, zero-padded)
    # w_ref  : (Cout, KKCp)    conv weight, OIHW-flattened (bias folded into ones column)
    # g_ref  : (Cout, H*W)     LayerNorm gamma (CHW-flattened)
    # bt_ref : (Cout, H*W)     LayerNorm beta
    # o_ref  : (1, Cout, H*W)  output == flattened NCHW
    # Single MXU matmul: contraction over KKCp (lane-aligned), bias included.
    y = jnp.dot(w_ref[...], x_ref[0], preferred_element_type=jnp.float32)

    # LayerNorm over the full (C_out, H, W) slab of this sample, biased variance,
    # one-pass sum / sum-of-squares formulation.
    inv_n = 1.0 / y.size
    mean = jnp.sum(y) * inv_n
    mean_sq = jnp.sum(y * y) * inv_n
    var = mean_sq - mean * mean
    z = (y - mean) * jax.lax.rsqrt(var + _LN_EPS)
    z = z * g_ref[...] + bt_ref[...]

    # Exact (erf-based) GELU, matching nn.GELU() default.
    o_ref[0] = 0.5 * z * (1.0 + jax.lax.erf(z * _INV_SQRT2))


def cnn_block(x_nchw, w_oihw, bias, gamma_chw, beta_chw):
    N, Cin, H, W = x_nchw.shape
    Cout, _, K, _ = w_oihw.shape
    pad = K // 2
    HW = H * W
    KKC = Cin * K * K
    # Contraction dim padded to a 128-aligned size; the slot at index KKC carries
    # a row of ones so the conv bias rides the MXU matmul for free.
    KKCp = ((KKC + 1 + 127) // 128) * 128

    # --- Glue: im2col + flatten params, all in plain JAX (NCHW throughout). ---
    x = x_nchw.astype(jnp.float32)
    x_pad = jnp.pad(x, ((0, 0), (0, 0), (pad, pad), (pad, pad)))
    # Tap order (cin, di, dj) matches the OIHW weight flattening below.
    cols = []
    for di in range(K):
        for dj in range(K):
            cols.append(x_pad[:, :, di:di + H, dj:dj + W].reshape(N, Cin, HW))
    x_col = jnp.stack(cols, axis=2).reshape(N, KKC, HW)          # (N, Cin*K*K, H*W)
    x_col = jnp.concatenate(
        [x_col,
         jnp.ones((N, 1, HW), jnp.float32),                       # bias "input"
         jnp.zeros((N, KKCp - KKC - 1, HW), jnp.float32)], axis=1)  # alignment pad

    w2 = w_oihw.reshape(Cout, KKC).astype(jnp.float32)            # (Cout, Cin*K*K)
    w2 = jnp.concatenate(
        [w2,
         bias.reshape(Cout, 1).astype(jnp.float32),               # bias column
         jnp.zeros((Cout, KKCp - KKC - 1), jnp.float32)], axis=1)  # alignment pad

    g2 = gamma_chw.reshape(Cout, HW).astype(jnp.float32)          # (Cout, H*W)
    bt2 = beta_chw.reshape(Cout, HW).astype(jnp.float32)          # (Cout, H*W)

    out = pl.pallas_call(
        _cnn_block_kernel,
        out_shape=jax.ShapeDtypeStruct((N, Cout, HW), jnp.float32),
        grid=(N,),
        in_specs=[
            pl.BlockSpec((1, KKCp, HW), lambda n: (n, 0, 0)),     # per-sample im2col slab
            pl.BlockSpec((Cout, KKCp), lambda n: (0, 0)),         # weights+bias (resident)
            pl.BlockSpec((Cout, HW), lambda n: (0, 0)),           # gamma
            pl.BlockSpec((Cout, HW), lambda n: (0, 0)),           # beta
        ],
        out_specs=pl.BlockSpec((1, Cout, HW), lambda n: (n, 0, 0)),
        compiler_params=pltpu.CompilerParams(
            dimension_semantics=("parallel",)),
    )(x_col, w2, g2, bt2)

    # (N, Cout, H*W) is already NCHW-flattened -> just reshape, no transpose.
    return out.reshape(N, Cout, H, W)


def _reference(x_nchw, w_oihw, bias, gamma_chw, beta_chw):
    """Pure-JAX reference mirroring the PyTorch module."""
    conv = jax.lax.conv_general_dilated(
        x_nchw, w_oihw, window_strides=(1, 1), padding="SAME",
        dimension_numbers=("NCHW", "OIHW", "NCHW"))
    conv = conv + bias[None, :, None, None]
    mean = conv.mean(axis=(1, 2, 3), keepdims=True)
    var = ((conv - mean) ** 2).mean(axis=(1, 2, 3), keepdims=True)
    normed = (conv - mean) * jax.lax.rsqrt(var + _LN_EPS)
    z = normed * gamma_chw[None] + beta_chw[None]
    return 0.5 * z * (1.0 + jax.lax.erf(z * _INV_SQRT2))


if __name__ == "__main__":
    # Small shapes consistent with the module: in_channels=4, out_channels=8,
    # expected_shape=(16, 16), kernel_size=7.
    N, Cin, Cout, H, W, K = 2, 4, 8, 16, 16, 7

    key = jax.random.PRNGKey(0)
    kx, kw, kb = jax.random.split(key, 3)
    x = jax.random.normal(kx, (N, Cin, H, W), dtype=jnp.float32)
    w = 0.05 * jax.random.normal(kw, (Cout, Cin, K, K), dtype=jnp.float32)
    b = 0.05 * jax.random.normal(kb, (Cout,), dtype=jnp.float32)
    gamma = jnp.ones((Cout, H, W), dtype=jnp.float32)   # LayerNorm default init
    beta = jnp.zeros((Cout, H, W), dtype=jnp.float32)

    out = jax.block_until_ready(cnn_block(x, w, b, gamma, beta))
    ref = jax.block_until_ready(_reference(x, w, b, gamma, beta))

    assert out.shape == (N, Cout, H, W), out.shape
    np.testing.assert_allclose(np.asarray(out), np.asarray(ref), rtol=2e-3, atol=2e-3)
    print("KERNEL_OK")
</pallas_src>

<mosaic_0001>
module attributes {stable_mosaic.version = 11 : i64} {
  func.func @_cnn_block_kernel(%arg0: i32, %arg1: memref<1x256x256xf32, #tpu.memory_space<vmem>>, %arg2: memref<8x256xf32, #tpu.memory_space<vmem>>, %arg3: memref<8x256xf32, #tpu.memory_space<vmem>>, %arg4: memref<8x256xf32, #tpu.memory_space<vmem>>, %arg5: memref<1x8x256xf32, #tpu.memory_space<vmem>>) attributes {dimension_semantics = [#tpu.dimension_semantics<parallel>], iteration_bounds = array<i64: 2>, scalar_prefetch = 0 : i64, scratch_operands = 0 : i64, tpu.core_type = #tpu.core_type<tc>, window_params = [{transform_indices = @transform_0, window_bounds = array<i64: 1, 256, 256>}, {pipeline_mode = #tpu.pipeline_mode<synchronous>, transform_indices = @transform_1, window_bounds = array<i64: 8, 256>}, {pipeline_mode = #tpu.pipeline_mode<synchronous>, transform_indices = @transform_2, window_bounds = array<i64: 8, 256>}, {pipeline_mode = #tpu.pipeline_mode<synchronous>, transform_indices = @transform_3, window_bounds = array<i64: 8, 256>}, {transform_indices = @transform_4, window_bounds = array<i64: 1, 8, 256>}]} {
    %c0 = arith.constant 0 : index
    %c0_0 = arith.constant 0 : index
    %0 = vector.load %arg2[%c0, %c0_0] : memref<8x256xf32, #tpu.memory_space<vmem>>, vector<8x256xf32>
    %c0_1 = arith.constant 0 : index
    %c0_2 = arith.constant 0 : index
    %c0_3 = arith.constant 0 : index
    %1 = vector.load %arg1[%c0_1, %c0_2, %c0_3] : memref<1x256x256xf32, #tpu.memory_space<vmem>>, vector<1x256x256xf32>
    %2 = vector.shape_cast %1 : vector<1x256x256xf32> to vector<256x256xf32>
    %cst = arith.constant dense<0.000000e+00> : vector<8x256xf32>
    %3 = tpu.matmul %0, %2, %cst {dimension_numbers = #tpu.dot_dimension_numbers<[1], [0], [0], [1], [0, 0, 1, 1], [], []>} : vector<8x256xf32>, vector<256x256xf32>, vector<8x256xf32> -> vector<8x256xf32>
    %4 = vector.shape_cast %3 : vector<8x256xf32> to vector<1x8x256xf32>
    %cst_4 = arith.constant dense<0.000000e+00> : vector<1xf32>
    %5 = vector.multi_reduction <add>, %4, %cst_4 [1, 2] : vector<1x8x256xf32> to vector<1xf32>
    %6 = vector.shape_cast %5 : vector<1xf32> to vector<1x1x1xf32>
    %7 = vector.extract %6[0, 0, 0] : f32 from vector<1x1x1xf32>
    %cst_5 = arith.constant 4.8828125E-4 : f32
    %8 = arith.mulf %7, %cst_5 : f32
    %9 = arith.mulf %3, %3 : vector<8x256xf32>
    %10 = vector.shape_cast %9 : vector<8x256xf32> to vector<1x8x256xf32>
    %cst_6 = arith.constant dense<0.000000e+00> : vector<1xf32>
    %11 = vector.multi_reduction <add>, %10, %cst_6 [1, 2] : vector<1x8x256xf32> to vector<1xf32>
    %12 = vector.shape_cast %11 : vector<1xf32> to vector<1x1x1xf32>
    %13 = vector.extract %12[0, 0, 0] : f32 from vector<1x1x1xf32>
    %cst_7 = arith.constant 4.8828125E-4 : f32
    %14 = arith.mulf %13, %cst_7 : f32
    %15 = arith.mulf %8, %8 : f32
    %16 = arith.subf %14, %15 : f32
    %17 = vector.broadcast %8 : f32 to vector<8x256xf32>
    %18 = arith.subf %3, %17 : vector<8x256xf32>
    %cst_8 = arith.constant 9.99999974E-6 : f32
    %19 = arith.addf %16, %cst_8 : f32
    %20 = math.rsqrt %19 : f32
    %21 = vector.broadcast %20 : f32 to vector<8x256xf32>
    %22 = arith.mulf %18, %21 : vector<8x256xf32>
    %c0_9 = arith.constant 0 : index
    %c0_10 = arith.constant 0 : index
    %23 = vector.load %arg3[%c0_9, %c0_10] : memref<8x256xf32, #tpu.memory_space<vmem>>, vector<8x256xf32>
    %24 = arith.mulf %22, %23 : vector<8x256xf32>
    %c0_11 = arith.constant 0 : index
    %c0_12 = arith.constant 0 : index
    %25 = vector.load %arg4[%c0_11, %c0_12] : memref<8x256xf32, #tpu.memory_space<vmem>>, vector<8x256xf32>
    %26 = arith.addf %24, %25 : vector<8x256xf32>
    %cst_13 = arith.constant 5.000000e-01 : f32
    %27 = vector.broadcast %cst_13 : f32 to vector<8x256xf32>
    %28 = arith.mulf %27, %26 : vector<8x256xf32>
    %cst_14 = arith.constant 0.707106769 : f32
    %29 = vector.broadcast %cst_14 : f32 to vector<8x256xf32>
    %30 = arith.mulf %26, %29 : vector<8x256xf32>
    %31 = math.erf %30 : vector<8x256xf32>
    %cst_15 = arith.constant 1.000000e+00 : f32
    %32 = vector.broadcast %cst_15 : f32 to vector<8x256xf32>
    %33 = arith.addf %32, %31 : vector<8x256xf32>
    %34 = arith.mulf %28, %33 : vector<8x256xf32>
    %c0_16 = arith.constant 0 : index
    %c0_17 = arith.constant 0 : index
    %c0_18 = arith.constant 0 : index
    %35 = vector.load %arg5[%c0_16, %c0_17, %c0_18] : memref<1x8x256xf32, #tpu.memory_space<vmem>>, vector<1x8x256xf32>
    %36 = vector.shape_cast %35 : vector<1x8x256xf32> to vector<8x256xf32>
    %37 = vector.shape_cast %34 : vector<8x256xf32> to vector<1x8x256xf32>
    tpu.vector_store %arg5[%c0_16, %c0_17, %c0_18], %37 {strides = array<i32>} : memref<1x8x256xf32, #tpu.memory_space<vmem>>, vector<1x8x256xf32>,
    return
  }
  func.func @transform_0(%arg0: i32) -> (i32, i32, i32) {
    %c0_i32 = arith.constant 0 : i32
    %c0_i32_0 = arith.constant 0 : i32
    %c0_i32_1 = arith.constant 0 : i32
    return %arg0, %c0_i32, %c0_i32_0 : i32, i32, i32
  }
  func.func @transform_1(%arg0: i32) -> (i32, i32) {
    %c0_i32 = arith.constant 0 : i32
    %c0_i32_0 = arith.constant 0 : i32
    %c0_i32_1 = arith.constant 0 : i32
    return %c0_i32, %c0_i32_0 : i32, i32
  }
  func.func @transform_2(%arg0: i32) -> (i32, i32) {
    %c0_i32 = arith.constant 0 : i32
    %c0_i32_0 = arith.constant 0 : i32
    %c0_i32_1 = arith.constant 0 : i32
    return %c0_i32, %c0_i32_0 : i32, i32
  }
  func.func @transform_3(%arg0: i32) -> (i32, i32) {
    %c0_i32 = arith.constant 0 : i32
    %c0_i32_0 = arith.constant 0 : i32
    %c0_i32_1 = arith.constant 0 : i32
    return %c0_i32, %c0_i32_0 : i32, i32
  }
  func.func @transform_4(%arg0: i32) -> (i32, i32, i32) {
    %c0_i32 = arith.constant 0 : i32
    %c0_i32_0 = arith.constant 0 : i32
    %c0_i32_1 = arith.constant 0 : i32
    return %arg0, %c0_i32, %c0_i32_0 : i32, i32, i32
  }
}

</mosaic_0001>

<bundles_post_ra>
// kernel: tpu_custom_call.1
= control target key start
LH: loop header
LB: loop body
LE: loop exit
PB: predicated region body
PF: predicated region fallthrough
CT: control target
= control target key end

     0   :  { %9 = vsyncpa [#allocation3], 0  ;;  %s1243_s0 = inlined_call_operand.hbm [shape: f32[2,256,256], index: 0, kind: input, shape index: {}]   ;;  %s1244_s1 = inlined_call_operand.hbm [shape: f32[8,256], index: 1, kind: input, shape index: {}]   ;;  %s1245_s2 = inlined_call_operand.hbm [shape: f32[8,256], index: 2, kind: input, shape index: {}]   ;;  %s1246_s3 = inlined_call_operand.hbm [shape: f32[8,256], index: 3, kind: input, shape index: {}]   ;;  %s1247_s4 = inlined_call_operand.hbm [shape: f32[2,8,256], index: 4, kind: output, shape index: {}]  }
   0x1   :  { %11 = vsyncpa [#allocation3 + $0x1], 0 }
   0x2   :  { %12 = vsyncpa [#allocation6], 0 }
   0x3   :  { %13 = vsyncpa [#allocation9], 0 }
   0x4   :  { %14 = vsyncpa [#allocation4], 0 }
   0x5   :  { %16 = vsyncpa [#allocation4 + $0x1], 0  ;;  %s1008_s15 = smov 0   ;;  %s1010_s16 = smov 0  }
   0x6   :  { %s1012_s17 = smov 0   ;;  %s1014_s18 = smov 0  }
   0x7 LB: > { %s1029_s19 = sadd.s32 4294967295, %s976_s18   ;;  %s667_s20 = sadd.s32 4294967294, %s976_s18   ;;  %s976_s18 = sphi %s1014_s18, %s1257_s18   ;;  %s972_s17 = sphi %s1012_s17, %s1256_s17   ;;  %s968_s16 = sphi %s1010_s16, %s1255_s16   ;;  %s964_s15 = sphi %s1008_s15, %s1254_s15  }
   0x8   : > { %p42_p0 = scmp.ne.s32.totalorder %s968_s16, %s964_s15  ;;  %p43_p1 = scmp.eq.s32.totalorder %s1029_s19, 0 }
   0x9   : > { %p129_p2 = scmp.eq.s32.totalorder %s1029_s19, 1  ;;  %p135_p3 = scmp.eq.s32.totalorder %s667_s20, 1 }
   0xa   : > { %p1038_p4 = por %p43_p1, %p42_p0  ;;  %p668_p5 = scmp.ge.s32.totalorder %s976_s18, 1 }
   0xb   : > { %p1043_p6 = por %p135_p3, %p42_p0  ;;  %p142_p7 = scmp.lt.s32.totalorder %s976_s18, 3 }
   0xc   : > { %s154_s25 = sshll.u32 %s1244_s1, 4  ;;  %s978_s27 = smov [#allocation5]   ;;  %s155_s25 = int_to_ptr.hbm [resolvable:$true] %s154_s25 }
   0xd   : > { %p1051_p8 = pnand %p668_p5, %p142_p7  ;;  %s156_s28 = sshll.u32 %s978_s27, 4  ;;  %s157_s28 = int_to_ptr.vmem [resolvable:$true] %s156_s28 }
   0xe   : > { %s166_s5 = sshll.u32 %s1245_s2, 4  ;;  %s178_s8 = sshll.u32 %s1246_s3, 4  ;;  %s167_s5 = int_to_ptr.hbm [resolvable:$true] %s166_s5  ;;  %s179_s8 = int_to_ptr.hbm [resolvable:$true] %s178_s8 }
   0xf   : > { %p713_p10 = pneg %p1051_p8  ;;  %s979_s9 = smov [#allocation7]  }
  0x10   : > { %s168_s10 = sshll.u32 %s979_s9, 4  ;;  %s980_s11 = smov [#allocation8]   ;;  %s169_s10 = int_to_ptr.vmem [resolvable:$true] %s168_s10 }
  0x11   : > { %p714_p11 = pnand %p713_p10, %p43_p1  ;;  %s180_s12 = sshll.u32 %s980_s11, 4  ;;  %s181_s12 = int_to_ptr.vmem [resolvable:$true] %s180_s12 }
  0x12   : > { %s1067_s13 = sadd.s32 1, %s976_s18   ;;  %s29_s20 = sadd.s32 1, %s972_s17 }
  0x13   : > { %716 = dma.hbm_to_vmem [thread:$0]  (!%p714_p11), %s155_s25, 256, %s157_s28, [#allocation6]  }
  0x14   : > { %719 = dma.hbm_to_vmem [thread:$0]  (!%p714_p11), %s167_s5, 256, %s169_s10, [#allocation6]  }
  0x15   : > { %722 = dma.hbm_to_vmem [thread:$0]  (!%p714_p11), %s179_s8, 256, %s181_s12, [#allocation9]  }
  0x16   : > { %s26_s14 = ssub.s32 %s976_s18, %s1067_s13  ;;  %p36_p13 = scmp.ne.s32.totalorder %s972_s17, %s968_s16 }
  0x17   : > { %p27_p12 = scmp.eq.s32.totalorder %s26_s14, 0  ;;  %p37_p0 = scmp.eq.s32.totalorder %s976_s18, 0 }
  0x18   : > { %p734_p3 = scmp.lt.s32.totalorder %s976_s18, 2  ;;  %p1081_p7 = por %p129_p2, %p36_p13 }
  0x19   : > { %s1077_s23 = scalar_select %p27_p12, %s972_s17, %s29_s20  }
  0x1a   : > { %p38_p5 = por %p37_p0, %p36_p13  ;;  %s191_s25 = sand.u32 1, %s972_s17  }
  0x1b   : > { %s689_s27 = sshll.u32 %s976_s18, 9  ;;  %s673_s28 = sshll.u32 %s191_s25, 9 }
  0x1c   : > { %s200_s5 = scalar_lea.hbm %s1243_s0, %s689_s27  ;;  %s195_s7 = scalar_lea.vmem [#allocation2], %s673_s28 }
  0x1d   : > { %s201_s6 = sshll.u32 %s200_s5, 4  ;;  %s203_s8 = sshll.u32 %s195_s7, 4  ;;  %s202_s6 = int_to_ptr.hbm [resolvable:$true] %s201_s6  ;;  %s204_s8 = int_to_ptr.vmem [resolvable:$true] %s203_s8 }
  0x1e   : > { %p1092_p10 = pnand %p734_p3, %p38_p5  ;;  %s192_s10 = scalar_lea.sflag [#allocation3], %s191_s25 }
  0x1f   : > { %s872_s11 = sshra.s32 %s202_s6, 4  ;;  %s879_s27 = scalar_lea.hbm %s1243_s0, 1024  ;;  %s873_s11 = int_to_ptr.hbm [resolvable:$true] %s872_s11 }
  0x20   : > { %s874_s12 = scalar_lea.hbm %s873_s11, 512  ;;  %p876_p11 = pneg %p1092_p10 }
  0x21   : > { %p875_p2 = scmp.ne.s32.totalorder %s873_s11, %s874_s12  ;;  %p880_p0 = scmp.lt.s32.totalorder %s873_s11, %s1243_s0 }
  0x22   : > { %p881_p3 = scmp.lt.s32.totalorder %s879_s27, %s874_s12 }
  0x23   : > { %p877_p12 = pnand %p876_p11, %p875_p2 }
  0x24   : > { %p882_p5 = por %p881_p3, %p880_p0 }
  0x25   : > { %p878_p13 = pneg %p877_p12 }
  0x27   : > { %p883_p9 = pnand %p882_p5, %p878_p13 }
  0x29   : > { %886 = shalt.err (!%p883_p9)
}
  0x2a   : > { %s981_s25 = smov 256   ;;  %s982_s30 = smov 16  }
  0x2b   : > { %726 = dma.hbm_to_vmem [thread:$0]  (!%p1092_p10), %s202_s6, 8192, %s204_s8, %s192_s10, %s981_s25, %s981_s25, %s982_s30  }
  0x2c   : > { %215 = sbr.rel (%p1051_p8) target bundleno = 546 (0x222), region = 36  ;;  %s1109_s5 = sand.u32 (!%p1051_p8), 1, %s968_s16  }
  0x2d   : > { %s677_s7 = sshll.u32 (!%p1051_p8), %s1109_s5, 9  ;;  %s218_s11 = scalar_lea.sflag (!%p1051_p8), [#allocation3], %s1109_s5 }
  0x2e   : > { %s1113_s12 = scalar_lea.vmem (!%p1051_p8), [#allocation2], %s677_s7 }
  0x31   : > { %947 = dma.done.wait (%p1038_p4), %s218_s11, 8192  }
  0x32   : > { %949 = vsyncadd (%p1038_p4), %s218_s11, 4294959104 }
  0x33   : > { %951 = dma.done.wait (%p43_p1), [#allocation6], 512  }
  0x34   : > { %953 = vsyncadd (%p43_p1), [#allocation6], 4294966784 }
  0x35   : > { %955 = dma.done.wait (%p43_p1), [#allocation9], 256  }
  0x36   : > { %957 = vsyncadd (%p43_p1), [#allocation9], 4294967040  ;;  %v295_v0 = vld [vmem:[%s1113_s12 + $0xf8] sm:$0xff]  ;;  %v293_v2 = vld [vmem:[%s1113_s12 + $0xe8] sm:$0xff]  ;;  %s681_s27 = sshll.u32 %s1109_s5, 4  ;;  %s690_s28 = sshll.u32 %s1029_s19, 4 }
  0x37   : > { %v327_v1 = vld [vmem:[%s1113_s12 + $0x1f8] sm:$0xff]  ;;  %368 = vmatpush.msra.mxu2 %v295_v0  ;;  %v325_v3 = vld [vmem:[%s1113_s12 + $0x1e8] sm:$0xff]  ;;  %v294_v6 = vld [vmem:[%s1113_s12 + $0xf0] sm:$0xff]  ;;  %s563_s30 = scalar_lea.hbm %s1247_s4, %s690_s28  ;;  %s261_s7 = scalar_lea.vmem [#allocation10], %s681_s27 }
  0x38   : > { %388 = vmatpush.msra.mxu3 %v327_v1  ;;  %v291_v4 = vld [vmem:[%s1113_s12 + $0xd8] sm:$0xff]  ;;  %v326_v7 = vld [vmem:[%s1113_s12 + $0x1f0] sm:$0xff]  ;;  %v292_v8 = vld [vmem:[%s1113_s12 + $0xe0] sm:$0xff]  ;;  %328 = vmatpush.msra.mxu0 %v294_v6  ;;  %s565_s19 = sshll.u32 %s261_s7, 4  ;;  %s567_s11 = sshll.u32 %s563_s30, 4  ;;  %s566_s19 = int_to_ptr.vmem [resolvable:$true] %s565_s19  ;;  %s568_s11 = int_to_ptr.hbm [resolvable:$true] %s567_s11 }
  0x39   : > { %v323_v5 = vld [vmem:[%s1113_s12 + $0x1d8] sm:$0xff]  ;;  %369 = vmatpush.msra.mxu2 %v293_v2  ;;  %v324_v9 = vld [vmem:[%s1113_s12 + $0x1e0] sm:$0xff]  ;;  %348 = vmatpush.msra.mxu1 %v326_v7  ;;  %v289_v10 = vld [vmem:[%s1113_s12 + $0xc8] sm:$0xff] }
  0x3a   : > { %389 = vmatpush.msra.mxu3 %v325_v3  ;;  %v321_v11 = vld [vmem:[%s1113_s12 + $0x1c8] sm:$0xff]  ;;  %v290_v12 = vld [vmem:[%s1113_s12 + $0xd0] sm:$0xff]  ;;  %329 = vmatpush.msra.mxu0 %v292_v8  ;;  %v287_v14 = vld [vmem:[%s1113_s12 + $0xb8] sm:$0xff] }
  0x3b   : > { %370 = vmatpush.msra.mxu2 %v291_v4  ;;  %v322_v13 = vld [vmem:[%s1113_s12 + $0x1d0] sm:$0xff]  ;;  %349 = vmatpush.msra.mxu1 %v324_v9  ;;  %v319_v15 = vld [vmem:[%s1113_s12 + $0x1b8] sm:$0xff]  ;;  %v288_v16 = vld [vmem:[%s1113_s12 + $0xc0] sm:$0xff] }
  0x3c   : > { %390 = vmatpush.msra.mxu3 %v323_v5  ;;  %v320_v17 = vld [vmem:[%s1113_s12 + $0x1c0] sm:$0xff]  ;;  %330 = vmatpush.msra.mxu0 %v290_v12  ;;  %v285_v18 = vld [vmem:[%s1113_s12 + $0xa8] sm:$0xff]  ;;  %v286_v20 = vld [vmem:[%s1113_s12 + $0xb0] sm:$0xff] }
  0x3d   : > { %371 = vmatpush.msra.mxu2 %v289_v10  ;;  %350 = vmatpush.msra.mxu1 %v322_v13  ;;  %v317_v19 = vld [vmem:[%s1113_s12 + $0x1a8] sm:$0xff]  ;;  %v318_v21 = vld [vmem:[%s1113_s12 + $0x1b0] sm:$0xff]  ;;  %v283_v22 = vld [vmem:[%s1113_s12 + $0x98] sm:$0xff] }
  0x3e   : > { %391 = vmatpush.msra.mxu3 %v321_v11  ;;  %331 = vmatpush.msra.mxu0 %v288_v16  ;;  %v315_v23 = vld [vmem:[%s1113_s12 + $0x198] sm:$0xff]  ;;  %v284_v24 = vld [vmem:[%s1113_s12 + $0xa0] sm:$0xff]  ;;  %v281_v26 = vld [vmem:[%s1113_s12 + $0x88] sm:$0xff] }
  0x3f   : > { %372 = vmatpush.msra.mxu2 %v287_v14  ;;  %351 = vmatpush.msra.mxu1 %v320_v17  ;;  %v316_v25 = vld [vmem:[%s1113_s12 + $0x1a0] sm:$0xff]  ;;  %v313_v27 = vld [vmem:[%s1113_s12 + $0x188] sm:$0xff]  ;;  %v282_v28 = vld [vmem:[%s1113_s12 + $0x90] sm:$0xff] }
  0x40   : > { %392 = vmatpush.msra.mxu3 %v319_v15  ;;  %332 = vmatpush.msra.mxu0 %v286_v20  ;;  %v314_v29 = vld [vmem:[%s1113_s12 + $0x190] sm:$0xff]  ;;  %v279_v30 = vld [vmem:[%s1113_s12 + $0x78] sm:$0xff]  ;;  %v280_v32 = vld [vmem:[%s1113_s12 + $0x80] sm:$0xff] }
  0x41   : > { %373 = vmatpush.msra.mxu2 %v285_v18  ;;  %352 = vmatpush.msra.mxu1 %v318_v21  ;;  %v311_v31 = vld [vmem:[%s1113_s12 + $0x178] sm:$0xff]  ;;  %v312_v33 = vld [vmem:[%s1113_s12 + $0x180] sm:$0xff]  ;;  %v277_v34 = vld [vmem:[%s1113_s12 + $0x68] sm:$0xff] }
  0x42   : > { %393 = vmatpush.msra.mxu3 %v317_v19  ;;  %333 = vmatpush.msra.mxu0 %v284_v24  ;;  %v309_v35 = vld [vmem:[%s1113_s12 + $0x168] sm:$0xff]  ;;  %v278_v36 = vld [vmem:[%s1113_s12 + $0x70] sm:$0xff]  ;;  %v275_v38 = vld [vmem:[%s1113_s12 + $0x58] sm:$0xff] }
  0x43   : > { %374 = vmatpush.msra.mxu2 %v283_v22  ;;  %353 = vmatpush.msra.mxu1 %v316_v25  ;;  %v310_v37 = vld [vmem:[%s1113_s12 + $0x170] sm:$0xff]  ;;  %v307_v39 = vld [vmem:[%s1113_s12 + $0x158] sm:$0xff]  ;;  %v276_v40 = vld [vmem:[%s1113_s12 + $0x60] sm:$0xff] }
  0x44   : > { %394 = vmatpush.msra.mxu3 %v315_v23  ;;  %334 = vmatpush.msra.mxu0 %v282_v28  ;;  %v308_v41 = vld [vmem:[%s1113_s12 + $0x160] sm:$0xff]  ;;  %v273_v42 = vld [vmem:[%s1113_s12 + $0x48] sm:$0xff]  ;;  %v274_v44 = vld [vmem:[%s1113_s12 + $0x50] sm:$0xff] }
  0x45   : > { %375 = vmatpush.msra.mxu2 %v281_v26  ;;  %354 = vmatpush.msra.mxu1 %v314_v29  ;;  %v305_v43 = vld [vmem:[%s1113_s12 + $0x148] sm:$0xff]  ;;  %v306_v45 = vld [vmem:[%s1113_s12 + $0x150] sm:$0xff]  ;;  %v271_v46 = vld [vmem:[%s1113_s12 + $0x38] sm:$0xff] }
  0x46   : > { %395 = vmatpush.msra.mxu3 %v313_v27  ;;  %335 = vmatpush.msra.mxu0 %v280_v32  ;;  %v303_v47 = vld [vmem:[%s1113_s12 + $0x138] sm:$0xff]  ;;  %v272_v48 = vld [vmem:[%s1113_s12 + $0x40] sm:$0xff]  ;;  %v269_v50 = vld [vmem:[%s1113_s12 + $0x28] sm:$0xff] }
  0x47   : > { %376 = vmatpush.msra.mxu2 %v279_v30  ;;  %355 = vmatpush.msra.mxu1 %v312_v33  ;;  %v304_v49 = vld [vmem:[%s1113_s12 + $0x140] sm:$0xff]  ;;  %v301_v51 = vld [vmem:[%s1113_s12 + $0x128] sm:$0xff]  ;;  %v270_v52 = vld [vmem:[%s1113_s12 + $0x30] sm:$0xff] }
  0x48   : > { %396 = vmatpush.msra.mxu3 %v311_v31  ;;  %336 = vmatpush.msra.mxu0 %v278_v36  ;;  %v302_v53 = vld [vmem:[%s1113_s12 + $0x130] sm:$0xff]  ;;  %v267_v54 = vld [vmem:[%s1113_s12 + $0x18] sm:$0xff]  ;;  %v268_v56 = vld [vmem:[%s1113_s12 + $0x20] sm:$0xff] }
  0x49   : > { %377 = vmatpush.msra.mxu2 %v277_v34  ;;  %356 = vmatpush.msra.mxu1 %v310_v37  ;;  %v299_v55 = vld [vmem:[%s1113_s12 + $0x118] sm:$0xff]  ;;  %v300_v57 = vld [vmem:[%s1113_s12 + $0x120] sm:$0xff]  ;;  %v265_v58 = vld [vmem:[%s1113_s12 + $0x8] sm:$0xff] }
  0x4a   : > { %397 = vmatpush.msra.mxu3 %v309_v35  ;;  %337 = vmatpush.msra.mxu0 %v276_v40  ;;  %v297_v59 = vld [vmem:[%s1113_s12 + $0x108] sm:$0xff]  ;;  %v262_v60 = vld [vmem:[#allocation5] sm:$0xff]  ;;  %v266_v62 = vld [vmem:[%s1113_s12 + $0x10] sm:$0xff] }
  0x4b   : > { %378 = vmatpush.msra.mxu2 %v275_v38  ;;  %357 = vmatpush.msra.mxu1 %v308_v41  ;;  %v263_v61 = vld [vmem:[#allocation5 + $0x8] sm:$0xff]  ;;  %v298_v63 = vld [vmem:[%s1113_s12 + $0x110] sm:$0xff]  ;;  %v264_v0 = vld [vmem:[%s1113_s12] sm:$0xff] }
  0x4c   : > { %398 = vmatpush.msra.mxu3 %v307_v39  ;;  %338 = vmatpush.msra.mxu0 %v274_v44  ;;  %v296_v1 = vld [vmem:[%s1113_s12 + $0x100] sm:$0xff]  ;;  %v453_v38 = vld [vmem:[#allocation7] sm:$0xff]  ;;  %v454_v39 = vld [vmem:[#allocation7 + $0x8] sm:$0xff]  ;;  %s552_s12 = scalar_lea.sflag [#allocation4], %s1109_s5 }
  0x4d   : > { %379 = vmatpush.msra.mxu2 %v273_v42  ;;  %358 = vmatpush.msra.mxu1 %v306_v45  ;;  %v457_v42 = vld [vmem:[#allocation8] sm:$0xff] }
  0x4e   : > { %399 = vmatpush.msra.mxu3 %v305_v43  ;;  %339 = vmatpush.msra.mxu0 %v272_v48  ;;  %v458_v43 = vld [vmem:[#allocation8 + $0x8] sm:$0xff] }
  0x4f   : > { %380 = vmatpush.msra.mxu2 %v271_v46  ;;  %359 = vmatpush.msra.mxu1 %v304_v49 }
  0x50   : > { %400 = vmatpush.msra.mxu3 %v303_v47  ;;  %340 = vmatpush.msra.mxu0 %v270_v52 }
  0x51   : > { %381 = vmatpush.msra.mxu2 %v269_v50  ;;  %360 = vmatpush.msra.mxu1 %v302_v53 }
  0x52   : > { %401 = vmatpush.msra.mxu3 %v301_v51  ;;  %341 = vmatpush.msra.mxu0 %v268_v56 }
  0x53   : > { %382 = vmatpush.msra.mxu2 %v267_v54  ;;  %361 = vmatpush.msra.mxu1 %v300_v57 }
  0x54   : > { %402 = vmatpush.msra.mxu3 %v299_v55  ;;  %342 = vmatpush.msra.mxu0 %v266_v62 }
  0x55   : > { %383 = vmatpush.msra.mxu2 %v265_v58  ;;  %362 = vmatpush.msra.mxu1 %v298_v63 }
  0x56   : > { %403 = vmatpush.msra.mxu3 %v297_v59  ;;  %384 = vmatmul.f32.vlgmr.msra.gmra.mxu2 %v262_v60 }
  0x57   : > { %404 = vmatmul.f32.vlgmr.msra.gmra.mxu3 %v263_v61  ;;  %343 = vmatpush.msra.mxu0 %v264_v0 }
  0x58   : > { %363 = vmatpush.msra.mxu1 %v296_v1  ;;  %344 = vmatmul.f32.vlgmr.msra.gmra.mxu0 %v262_v60 }
  0x59   : > { %364 = vmatmul.f32.vlgmr.msra.gmra.mxu1 %v263_v61 }
  0xd5   : > { %v345_v2 = vpop.f32.mrf.mxu0 }
  0xd6   : > { %v365_v3 = vpop.f32.mrf.mxu1 }
  0xd7   : > { %v366_v4 = vadd.f32 %v365_v3, %v345_v2 }
  0xd9   : > { %v385_v5 = vpop.f32.mrf.mxu2  ;;  %v419_v9 = vmul.f32 %v366_v4, %v366_v4 }
  0xda   : > { %v405_v6 = vpop.f32.mrf.mxu3 }
  0xdb   : > { %v406_v7 = vadd.f32 %v405_v6, %v385_v5 }
  0xdd   : > { %v408_v8 = vadd.f32 %v406_v7, %v366_v4  ;;  %v420_v10 = vmul.f32 %v406_v7, %v406_v7 }
  0xdf   : > { %409 = vadd.xlane.f32.xlu0 %v408_v8  ;;  %v421_v11 = vadd.f32 %v420_v10, %v419_v9 }
  0xe7   : > { %422 = vadd.xlane.f32.xlu0 %v421_v11 }
 0x152   : > { %v410_v12 = vpop.xlane.xlu0 %409 }
 0x153   : > { %v411_v13 = vrot.slane %v410_v12, 4 }
 0x155   : > { %v412_v14 = vadd.f32 %v411_v13, %v410_v12 }
 0x157   : > { %v413_v15 = vrot.slane %v412_v14, 2 }
 0x159   : > { %v414_v16 = vadd.f32 %v413_v15, %v412_v14 }
 0x15a   : > { %v423_v17 = vpop.xlane.xlu0 %422 }
 0x15b   : > { %v424_v18 = vrot.slane %v423_v17, 4  ;;  %v415_v19 = vrot.slane %v414_v16, 1 }
 0x15d   : > { %v425_v20 = vadd.f32 %v424_v18, %v423_v17  ;;  %v416_v21 = vadd.f32 %v415_v19, %v414_v16 }
 0x15f   : > { %v426_v22 = vrot.slane %v425_v20, 2  ;;  %691 = vpush %v416_v21 }
 0x161   : > { %v427_v23 = vadd.f32 %v426_v22, %v425_v20 }
 0x163   : > { %v428_v24 = vrot.slane %v427_v23, 1 }
 0x165   : > { %v429_v25 = vadd.f32 %v428_v24, %v427_v23 }
 0x167   : > { %693 = vpush %v429_v25 }
 0x190   : > { %s692_s21 = spop %691 }
 0x191   : > { %s418_s26 = smul.f32 0.00048828125, %s692_s21  ;;  %s916_s21 = sshra.s32 %s568_s11, 4  ;;  %s917_s21 = int_to_ptr.hbm [resolvable:$true] %s916_s21 }
 0x192   : > { %p923_p9 = scmp.lt.s32.totalorder %s917_s21, %s1247_s4 }
 0x193   : > { %s432_s6 = smul.f32 %s418_s26, %s418_s26  ;;  %v434_v34 = vstv %s418_s26  ;;  %s918_s26 = scalar_lea.hbm %s917_s21, 16 }
 0x194   : > { %v435_v35 = vsub.f32 %v366_v4, %v434_v34  ;;  %v436_v36 = vsub.f32 %v406_v7, %v434_v34  ;;  %p919_p1 = scmp.ne.s32.totalorder %s917_s21, %s918_s26 }
 0x196   : > { %p920_p4 = pnand %p919_p1, %p1081_p7 }
 0x198   : > { %s694_s8 = spop %693  ;;  %p921_p8 = pneg %p920_p4 }
 0x199   : > { %s431_s9 = smul.f32 0.00048828125, %s694_s8 }
 0x19b   : > { %s433_s10 = ssub.f32 %s431_s9, %s432_s6  ;;  %s922_s9 = scalar_lea.hbm %s1247_s4, 32 }
 0x19c   : > { %p924_p10 = scmp.lt.s32.totalorder %s922_s9, %s918_s26 }
 0x19d   : > { %s437_s14 = sadd.f32 1e-05, %s433_s10 }
 0x19e   : > { %p925_p2 = por %p924_p10, %p923_p9 }
 0x19f   : > { %v438_v26 = vstv %s437_s14 }
 0x1a0   : > { %776 = vrsqrt.f32 %v438_v26  ;;  %vm445_vm1 = vweird.f32 %v438_v26  ;;  %p926_p11 = pnand %p925_p2, %p921_p8 }
 0x1a6   : > { %v777_v27 = vpop.eup %776 }
 0x1a7   : > { %v440_v28 = vmul.f32 %v777_v27, %v438_v26  ;;  %vm446_vm0 = vweird.f32 %v777_v27 }
 0x1a8   : > { %vm447_vm2 = vmor %vm445_vm1, %vm446_vm0 }
 0x1a9   : > { %v441_v29 = vmul.f32 %v777_v27, %v440_v28 }
 0x1ab   : > { %v442_v30 = vmul.f32 0.5, %v441_v29 }
 0x1ad   : > { %v443_v31 = vsub.f32 1.5, %v442_v30 }
 0x1af   : > { %v444_v32 = vmul.f32 %v777_v27, %v443_v31 }
 0x1b1   : > { %v448_v33 = vsel %vm447_vm2, %v777_v27, %v444_v32 }
 0x1b2   : > { %695 = vpush %v448_v33 }
 0x1e3   : > { %s696_s20 = spop %695 }
 0x1e4   : > { %v450_v37 = vstv %s696_s20 }
 0x1e5   : > { %v451_v40 = vmul.f32 %v450_v37, %v435_v35  ;;  %v452_v41 = vmul.f32 %v450_v37, %v436_v36 }
 0x1e7   : > { %v455_v44 = vmul.f32 %v453_v38, %v451_v40  ;;  %v456_v45 = vmul.f32 %v454_v39, %v452_v41 }
 0x1e9   : > { %v1191_v46 = vadd.f32 %v457_v42, %v455_v44  ;;  %v1193_v47 = vadd.f32 %v458_v43, %v456_v45 }
 0x1eb   : > { %v1196_v48 = vmul.f32 0.70710677, %v1191_v46  ;;  %v1199_v49 = vmul.f32 0.70710677, %v1193_v47 }
 0x1ed   : > { %v465_v50 = vmul.f32 %v1196_v48, %v1196_v48  ;;  %v505_v51 = vmul.f32 %v1199_v49, %v1199_v49 }
 0x1ef   : > { %v466_v52 = vmin.f32 %v465_v50, 16.0  ;;  %v506_v53 = vmin.f32 %v505_v51, 16.0 }
 0x1f1   : > { %v467_v54 = vmul.f32 2.1237322e-06, %v466_v52  ;;  %v478_v55 = vmul.f32 3.8918573e-05, %v466_v52  ;;  %v507_v56 = vmul.f32 2.1237322e-06, %v506_v53 }
 0x1f2   : > { %v518_v57 = vmul.f32 3.8918573e-05, %v506_v53 }
 0x1f3   : > { %v468_v58 = vadd.f32 0.00028619796, %v467_v54  ;;  %v479_v59 = vadd.f32 0.001143296, %v478_v55  ;;  %v508_v60 = vadd.f32 0.00028619796, %v507_v56 }
 0x1f4   : > { %v519_v61 = vadd.f32 0.001143296, %v518_v57 }
 0x1f5   : > { %v469_v62 = vmul.f32 %v468_v58, %v466_v52  ;;  %v480_v63 = vmul.f32 %v479_v59, %v466_v52  ;;  %v509_v0 = vmul.f32 %v508_v60, %v506_v53  ;;  %v461_v59 = vmul.f32 0.5, %v1191_v46 }
 0x1f6   : > { %v520_v1 = vmul.f32 %v519_v61, %v506_v53 }
 0x1f7   : > { %v470_v2 = vadd.f32 0.0036580483, %v469_v62  ;;  %v481_v3 = vadd.f32 0.014752088, %v480_v63  ;;  %v510_v6 = vadd.f32 0.0036580483, %v509_v0 }
 0x1f8   : > { %v521_v4 = vadd.f32 0.014752088, %v520_v1 }
 0x1f9   : > { %v482_v5 = vmul.f32 %v481_v3, %v466_v52  ;;  %v471_v8 = vmul.f32 %v470_v2, %v466_v52  ;;  %v511_v12 = vmul.f32 %v510_v6, %v506_v53 }
 0x1fa   : > { %v522_v7 = vmul.f32 %v521_v4, %v506_v53 }
 0x1fb   : > { %v483_v9 = vadd.f32 0.112945676, %v482_v5  ;;  %v472_v14 = vadd.f32 0.05243302, %v471_v8  ;;  %v512_v18 = vadd.f32 0.05243302, %v511_v12 }
 0x1fc   : > { %v523_v10 = vadd.f32 0.112945676, %v522_v7 }
 0x1fd   : > { %v484_v11 = vmul.f32 %v483_v9, %v466_v52  ;;  %v473_v20 = vmul.f32 %v472_v14, %v466_v52  ;;  %v513_v23 = vmul.f32 %v512_v18, %v506_v53 }
 0x1fe   : > { %v524_v13 = vmul.f32 %v523_v10, %v506_v53 }
 0x1ff   : > { %v485_v15 = vadd.f32 0.4994258, %v484_v11  ;;  %v474_v24 = vadd.f32 0.18741608, %v473_v20  ;;  %v514_v25 = vadd.f32 0.18741608, %v513_v23 }
 0x200   : > { %v525_v16 = vadd.f32 0.4994258, %v524_v13 }
 0x201   : > { %v486_v17 = vmul.f32 %v485_v15, %v466_v52  ;;  %v475_v27 = vmul.f32 %v474_v24, %v466_v52  ;;  %v515_v30 = vmul.f32 %v514_v25, %v506_v53 }
 0x202   : > { %v526_v19 = vmul.f32 %v525_v16, %v506_v53 }
 0x203   : > { %v487_v21 = vadd.f32 1.0, %v486_v17  ;;  %v476_v33 = vadd.f32 1.1283791, %v475_v27  ;;  %v516_v39 = vadd.f32 1.1283791, %v515_v30 }
 0x204   : > { %v527_v22 = vadd.f32 1.0, %v526_v19 }
 0x205   : > { %778 = vrcp.f32 %v487_v21  ;;  %v499_v34 = vand.u32 2147483648, %v487_v21  ;;  %v497_v37 = vand.u32 2147483647, %v487_v21  ;;  %vm493_vm5 = vweird.f32 %v487_v21 }
 0x206   : > { %780 = vrcp.f32 %v527_v22  ;;  %v539_v38 = vand.u32 2147483648, %v527_v22  ;;  %v537_v41 = vand.u32 2147483647, %v527_v22  ;;  %vm533_vm7 = vweird.f32 %v527_v22 }
 0x207   : > { %v500_v43 = vor.u32 1.1754944e-38, %v499_v34  ;;  %v477_v45 = vmul.f32 %v476_v33, %v1196_v48  ;;  %vm498_vm8 = vcmp.eq.f32.partialorder %v497_v37, 8.507059e+37  ;;  %v517_v53 = vmul.f32 %v516_v39, %v1199_v49 }
 0x208   : > { %v540_v51 = vor.u32 1.1754944e-38, %v539_v38  ;;  %vm538_vm10 = vcmp.eq.f32.partialorder %v537_v41, 8.507059e+37  ;;  %v462_v49 = vmul.f32 0.5, %v1193_v47 }
 0x20b   : > { %v779_v26 = vpop.eup %778 }
 0x20c   : > { %v781_v28 = vpop.eup %780  ;;  %v489_v29 = vmul.f32 %v779_v26, %v487_v21  ;;  %vm494_vm3 = vweird.f32 %v779_v26 }
 0x20d   : > { %v529_v31 = vmul.f32 %v781_v28, %v527_v22  ;;  %vm534_vm4 = vweird.f32 %v781_v28  ;;  %vm495_vm6 = vmor %vm493_vm5, %vm494_vm3 }
 0x20e   : > { %v490_v32 = vsub.f32 1.0, %v489_v29  ;;  %vm535_vm9 = vmor %vm533_vm7, %vm534_vm4 }
 0x20f   : > { %v530_v35 = vsub.f32 1.0, %v529_v31 }
 0x210   : > { %v491_v36 = vmul.f32 %v779_v26, %v490_v32 }
 0x211   : > { %v531_v40 = vmul.f32 %v781_v28, %v530_v35 }
 0x212   : > { %v492_v42 = vadd.f32 %v779_v26, %v491_v36 }
 0x213   : > { %v532_v44 = vadd.f32 %v781_v28, %v531_v40 }
 0x214   : > { %v496_v50 = vsel %vm495_vm6, %v779_v26, %v492_v42 }
 0x215   : > { %v501_v52 = vsel %vm498_vm8, %v500_v43, %v496_v50  ;;  %v536_v54 = vsel %vm535_vm9, %v781_v28, %v532_v44 }
 0x216   : > { %v502_v55 = vmul.f32 %v501_v52, %v477_v45  ;;  %v541_v56 = vsel %vm538_vm10, %v540_v51, %v536_v54 }
 0x217   : > { %v542_v57 = vmul.f32 %v541_v56, %v517_v53 }
 0x218   : > { %v682_v48 = vclamps-f32 %v502_v55, 1.0 }
 0x219   : > { %v683_v58 = vclamps-f32 %v542_v57, 1.0 }
 0x21a   : > { %v545_v60 = vadd.f32 1.0, %v682_v48 }
 0x21b   : > { %v546_v61 = vadd.f32 1.0, %v683_v58 }
 0x21c   : > { %v547_v62 = vmul.f32 %v545_v60, %v461_v59 }
 0x21d   : > { %v548_v63 = vmul.f32 %v546_v61, %v462_v49 }
 0x21e   : > { %549 = vst [vmem:[%s261_s7] sm:$0xff] %v547_v62 }
 0x21f   : > { %550 = vst [vmem:[%s261_s7 + $0x8] sm:$0xff] %v548_v63 }
 0x220   : > { %929 = shalt.err (!%p926_p11)
}
 0x221   : > { %711 = dma.vmem_to_hbm [thread:$0]  (%p1081_p7), %s566_s19, 256, %s568_s11, %s552_s12  }
 0x222 PF: > { %s579_s5 = sand.u32 1, %s964_s15   ;;  %p1253_p12 = scmp.ge.s32.totalorder %s976_s18, 2 }
 0x223   : > { %s580_s20 = scalar_lea.sflag [#allocation4], %s579_s5 }
 0x224   : > { %p728_p13 = pnand %p1253_p12, %p1043_p6 }
 0x226   : > { %p729_p0 = pneg %p728_p13 }
 0x228   : > { %959 = dma.done.wait (%p729_p0), %s580_s20, 256  }
 0x229   : > { %961 = vsyncadd (%p729_p0), %s580_s20, 4294967040  ;;  %p19_p3 = scmp.ge.s32.totalorder %s1067_s13, 4   ;;  %s1254_s15 = smov %s968_s16 }
 0x22a   : > { %s1255_s16 = smov %s972_s17  ;;  %s1256_s17 = smov %s1077_s23 }
 0x22b   : > { %s1257_s18 = smov %s1067_s13  ;;  %21 = sbr.rel (!%p19_p3) target bundleno = 7 (0x7), region = 93 }
 0x230   :  { %586 = vsyncpa [#allocation3], 1 }
 0x231   :  { %588 = vsyncpa [#allocation3 + $0x1], 1 }
 0x232   :  { %589 = vsyncpa [#allocation6], 1 }
 0x233   :  { %590 = vsyncpa [#allocation9], 1 }
 0x234   :  { %591 = vsyncpa [#allocation4], 1 }
 0x235   :  { %593 = vsyncpa [#allocation4 + $0x1], 1 }

</bundles_post_ra>
